<compile_context>
chip_gen: v5e
topology: v5e:2x2
jax: 0.10.0
libtpu: 0.0.40
codegen_flags: <defaults>
</compile_context>

<pallas_src>
import functools

import jax
import jax.numpy as jnp
from jax.experimental import pallas as pl
from jax.experimental.pallas import tpu as pltpu


def _round_up(n: int, m: int) -> int:
    return ((n + m - 1) // m) * m


def _pad2d(a, rows, cols):
    pr, pc = rows - a.shape[0], cols - a.shape[1]
    if pr or pc:
        a = jnp.pad(a, ((0, pr), (0, pc)))
    return a


def _vmem_capacity_bytes() -> int:
    try:
        return int(pltpu.get_tpu_info().vmem_capacity_bytes)
    except Exception:
        return 64 * 1024 * 1024  # conservative (v7x per-TC VMEM)


def _layernorm_f32(z, gamma_ref, beta_ref, eps: float, d_model: int):
    """LayerNorm over the real d_model lanes (padded lanes of z are zero)."""
    d_model_p = z.shape[-1]
    inv_d = 1.0 / d_model
    mean = jnp.sum(z, axis=-1, keepdims=True) * inv_d
    zc = z - mean
    if d_model != d_model_p:
        lane = jax.lax.broadcasted_iota(jnp.int32, (1, d_model_p), 1)
        zc = jnp.where(lane < d_model, zc, 0.0)
    var = jnp.sum(zc * zc, axis=-1, keepdims=True) * inv_d
    inv = jax.lax.rsqrt(var + eps)
    return (zc * inv * gamma_ref[...].astype(jnp.float32)
            + beta_ref[...].astype(jnp.float32))


# --------------------------------------------------------------------------
# Path A: both weight matrices resident in VMEM — single (row) grid axis.
# --------------------------------------------------------------------------
def _ffn_resident_kernel(x_ref, wi_ref, bi_ref, wo_ref, bo_ref,
                         gamma_ref, beta_ref, o_ref, *, eps: float, d_model: int):
    x = x_ref[...]
    h = jnp.dot(x, wi_ref[...], preferred_element_type=jnp.float32)
    h = jnp.maximum(h + bi_ref[...].astype(jnp.float32), 0.0)
    y = jnp.dot(h.astype(wo_ref.dtype), wo_ref[...],
                preferred_element_type=jnp.float32)
    y = y + bo_ref[...].astype(jnp.float32)
    z = x.astype(jnp.float32) + y            # residual (dropout == identity)
    o_ref[...] = _layernorm_f32(z, gamma_ref, beta_ref, eps, d_model).astype(o_ref.dtype)


# --------------------------------------------------------------------------
# Path B: stream W_i^T / W_o in K-chunks, f32 VMEM accumulator, epilogue on
# the last K step.
# --------------------------------------------------------------------------
def _ffn_streamed_kernel(x_ref, wi_t_ref, bi_ref, wo_ref, bo_ref,
                         gamma_ref, beta_ref, o_ref, acc_ref,
                         *, eps: float, d_model: int):
    k = pl.program_id(1)

    @pl.when(k == 0)
    def _init():
        acc_ref[...] = jnp.zeros_like(acc_ref)

    # W_i stored transposed: chunk is (tk, d_model_p) row-contiguous.
    # Contract the d_model axes (x last dim vs. wi_t last dim).
    h = jax.lax.dot_general(x_ref[...], wi_t_ref[...],
                            dimension_numbers=(((1,), (1,)), ((), ())),
                            preferred_element_type=jnp.float32)
    h = jnp.maximum(h + bi_ref[...].astype(jnp.float32), 0.0)
    acc_ref[...] += jnp.dot(h.astype(wo_ref.dtype), wo_ref[...],
                            preferred_element_type=jnp.float32)

    @pl.when(k == pl.num_programs(1) - 1)
    def _epilogue():
        y = acc_ref[...] + bo_ref[...].astype(jnp.float32)
        z = x_ref[...].astype(jnp.float32) + y      # residual (dropout == identity)
        o_ref[...] = _layernorm_f32(z, gamma_ref, beta_ref, eps, d_model).astype(o_ref.dtype)


def intermediate_forward(x, wi, bi, wo, bo, gamma, beta, *,
                         eps: float = 1e-5,
                         tile_rows: int = 256,
                         tile_k: int = 512,
                         compute_dtype=None):
    """x: (batch, seq, d_model). Linear weights stored as (in_features, out_features)."""
    batch, seq, d_model = x.shape
    d_int = wi.shape[1]
    rows = batch * seq

    if compute_dtype is not None:
        x = x.astype(compute_dtype)
        wi, bi = wi.astype(compute_dtype), bi.astype(compute_dtype)
        wo, bo = wo.astype(compute_dtype), bo.astype(compute_dtype)
    dtype = x.dtype
    itemsize = jnp.dtype(dtype).itemsize
    granule = 16 if itemsize == 2 else 8          # sublane-packing granule

    # --- per-generation VMEM sizing -------------------------------------
    vmem_cap = _vmem_capacity_bytes()
    big_vmem = vmem_cap >= 96 * 1024 * 1024        # v5e / v6e (128 MiB)
    budget = int(vmem_cap * (0.50 if big_vmem else 0.375))    # ~64 MiB / ~24 MiB
    limit_cap = int(vmem_cap * (0.82 if big_vmem else 0.75))  # ~105 MiB / ~48 MiB

    d_model_p = _round_up(d_model, 128)
    d_int_128 = _round_up(d_int, 128)

    # Row tile: multiple of granule; guarantee >=2 parallel tiles when possible
    # so v7x's two TensorCores both get work.
    rows_r = _round_up(rows, granule)
    tr = min(_round_up(tile_rows, granule), rows_r)
    if rows_r // tr < 2 and rows_r >= 2 * granule:
        tr = _round_up((rows_r + 1) // 2, granule)

    misc = 2 * (d_int_128 + 3 * d_model_p) * max(itemsize, 4)  # biases / affine rows

    # ---------------- Path A: resident weights ---------------------------
    def ws_resident(tr_):
        return (2 * tr_ * d_model_p * itemsize                      # x tile
                + 2 * tr_ * d_model_p * itemsize                    # out tile
                + 2 * (d_model_p * d_int_128 + d_int_128 * d_model_p) * itemsize
                + misc)

    if ws_resident(tr) <= budget:
        rows_p = _round_up(rows, tr)
        x2 = _pad2d(x.reshape(rows, d_model), rows_p, d_model_p)
        wi_p = _pad2d(wi, d_model_p, d_int_128)
        wo_p = _pad2d(wo, d_int_128, d_model_p)
        bi_p = _pad2d(bi.reshape(1, -1), 1, d_int_128)
        bo_p = _pad2d(bo.reshape(1, -1), 1, d_model_p)
        g_p = _pad2d(gamma.reshape(1, -1), 1, d_model_p)
        b_p = _pad2d(beta.reshape(1, -1), 1, d_model_p)

        kernel = functools.partial(_ffn_resident_kernel, eps=eps, d_model=d_model)
        flops = 4 * rows_p * d_model_p * d_int_128
        bytes_accessed = int((2 * rows_p * d_model_p + wi_p.size + wo_p.size
                              + bi_p.size + bo_p.size + g_p.size + b_p.size) * itemsize)
        vmem_limit = int(min(max(2 * ws_resident(tr), 32 << 20), limit_cap))

        out2 = pl.pallas_call(
            kernel,
            out_shape=jax.ShapeDtypeStruct((rows_p, d_model_p), dtype),
            grid_spec=pltpu.PrefetchScalarGridSpec(
                num_scalar_prefetch=0,
                grid=(rows_p // tr,),
                in_specs=[
                    pl.BlockSpec((tr, d_model_p),        lambda i: (i, 0)),  # x tile
                    pl.BlockSpec((d_model_p, d_int_128), lambda i: (0, 0)),  # W_i (resident)
                    pl.BlockSpec((1, d_int_128),         lambda i: (0, 0)),  # b_i
                    pl.BlockSpec((d_int_128, d_model_p), lambda i: (0, 0)),  # W_o (resident)
                    pl.BlockSpec((1, d_model_p),         lambda i: (0, 0)),  # b_o
                    pl.BlockSpec((1, d_model_p),         lambda i: (0, 0)),  # gamma
                    pl.BlockSpec((1, d_model_p),         lambda i: (0, 0)),  # beta
                ],
                out_specs=pl.BlockSpec((tr, d_model_p), lambda i: (i, 0)),
            ),
            compiler_params=pltpu.CompilerParams(
                dimension_semantics=("parallel",),
                vmem_limit_bytes=vmem_limit),
            cost_estimate=pl.CostEstimate(flops=int(flops), transcendentals=int(rows_p),
                                          bytes_accessed=bytes_accessed),
        )(x2, wi_p, bi_p, wo_p, bo_p, g_p, b_p)
        return out2[:rows, :d_model].reshape(batch, seq, d_model)

    # ---------------- Path B: K-streamed weights -------------------------
    tk = min(tile_k, d_int_128)
    min_tk = 512 if big_vmem else 256

    def ws_stream(tr_, tk_, nbuf=2):
        return (2 * tr_ * d_model_p * itemsize        # x tile
                + nbuf * tk_ * d_model_p * itemsize   # W_i^T chunk
                + nbuf * tk_ * d_model_p * itemsize   # W_o chunk
                + 2 * tr_ * d_model_p * itemsize      # out tile
                + tr_ * d_model_p * 4                 # f32 accumulator
                + misc)

    # Keep tk large (amortizes accumulator RMW and per-step overhead); shrink
    # tr before letting tk drop below min_tk.  Keep tk a multiple of 128 and
    # tr a multiple of the sublane granule.
    while ws_stream(tr, tk) > budget:
        if tk > min_tk and tk % 256 == 0:
            tk //= 2
        elif tr > granule:
            tr = max(granule, (tr // 2) // granule * granule)
        elif tk > 128 and tk % 256 == 0:
            tk //= 2
        else:
            break

    # Triple-buffer the streamed weight chunks when VMEM allows (v6e/v5e).
    nbuf = 3 if (big_vmem and ws_stream(tr, tk, nbuf=3) <= budget) else 2
    w_kwargs = {"pipeline_mode": pl.Buffered(nbuf)} if nbuf != 2 else {}

    rows_p = _round_up(rows, tr)
    d_int_p = _round_up(d_int, tk)

    x2 = _pad2d(x.reshape(rows, d_model), rows_p, d_model_p)
    wi_t = _pad2d(jnp.transpose(wi), d_int_p, d_model_p)   # (d_int, d_model): contiguous K rows
    wo_p = _pad2d(wo, d_int_p, d_model_p)
    bi_p = _pad2d(bi.reshape(1, -1), 1, d_int_p)
    bo_p = _pad2d(bo.reshape(1, -1), 1, d_model_p)
    g_p = _pad2d(gamma.reshape(1, -1), 1, d_model_p)
    b_p = _pad2d(beta.reshape(1, -1), 1, d_model_p)

    grid = (rows_p // tr, d_int_p // tk)   # rows parallel, reduction innermost
    kernel = functools.partial(_ffn_streamed_kernel, eps=eps, d_model=d_model)

    flops = 4 * rows_p * d_model_p * d_int_p
    bytes_accessed = int(
        (2 * rows_p * d_model_p
         + grid[0] * (wi_t.size + wo_p.size)
         + bi_p.size + bo_p.size + g_p.size + b_p.size) * itemsize)
    vmem_limit = int(min(max(2 * ws_stream(tr, tk, nbuf), 32 << 20), limit_cap))

    out2 = pl.pallas_call(
        kernel,
        out_shape=jax.ShapeDtypeStruct((rows_p, d_model_p), dtype),
        grid_spec=pltpu.PrefetchScalarGridSpec(
            num_scalar_prefetch=0,
            grid=grid,
            in_specs=[
                pl.BlockSpec((tr, d_model_p), lambda i, k: (i, 0)),              # x tile
                pl.BlockSpec((tk, d_model_p), lambda i, k: (k, 0), **w_kwargs),  # W_i^T chunk
                pl.BlockSpec((1, tk),         lambda i, k: (0, k)),              # b_i chunk
                pl.BlockSpec((tk, d_model_p), lambda i, k: (k, 0), **w_kwargs),  # W_o chunk
                pl.BlockSpec((1, d_model_p),  lambda i, k: (0, 0)),              # b_o
                pl.BlockSpec((1, d_model_p),  lambda i, k: (0, 0)),              # gamma
                pl.BlockSpec((1, d_model_p),  lambda i, k: (0, 0)),              # beta
            ],
            out_specs=pl.BlockSpec((tr, d_model_p), lambda i, k: (i, 0)),
            scratch_shapes=[pltpu.VMEM((tr, d_model_p), jnp.float32)],
        ),
        compiler_params=pltpu.CompilerParams(
            dimension_semantics=("parallel", "arbitrary"),
            vmem_limit_bytes=vmem_limit),
        cost_estimate=pl.CostEstimate(flops=int(flops), transcendentals=int(rows_p),
                                      bytes_accessed=bytes_accessed),
    )(x2, wi_t, bi_p, wo_p, bo_p, g_p, b_p)

    return out2[:rows, :d_model].reshape(batch, seq, d_model)


def _reference(x, wi, bi, wo, bo, gamma, beta, eps=1e-5):
    h = jnp.maximum(x @ wi + bi, 0.0)
    y = h @ wo + bo
    z = x + y
    mean = jnp.mean(z, axis=-1, keepdims=True)
    var = jnp.mean((z - mean) ** 2, axis=-1, keepdims=True)
    return (z - mean) * jax.lax.rsqrt(var + eps) * gamma + beta


if __name__ == "__main__":
    key = jax.random.PRNGKey(0)
    batch, seq = 2, 8
    d_model, d_intermediate = 32, 64

    k1, k2, k3, k4, k5 = jax.random.split(key, 5)
    x = jax.random.normal(k1, (batch, seq, d_model), dtype=jnp.float32)

    # deterministic parameter init (Linear weights stored as (in, out))
    wi = jax.random.normal(k2, (d_model, d_intermediate), dtype=jnp.float32) * 0.05
    bi = jax.random.normal(k3, (d_intermediate,), dtype=jnp.float32) * 0.01
    wo = jax.random.normal(k4, (d_intermediate, d_model), dtype=jnp.float32) * 0.05
    bo = jax.random.normal(k5, (d_model,), dtype=jnp.float32) * 0.01
    gamma = jnp.ones((d_model,), dtype=jnp.float32)
    beta = jnp.zeros((d_model,), dtype=jnp.float32)

    out = intermediate_forward(x, wi, bi, wo, bo, gamma, beta)
    out = jax.block_until_ready(out)

    ref = _reference(x, wi, bi, wo, bo, gamma, beta)
    assert out.shape == x.shape
    assert jnp.allclose(out, ref, atol=1e-4, rtol=1e-4), "mismatch vs reference"

    print("KERNEL_OK")
</pallas_src>

<mosaic_0001>
module attributes {stable_mosaic.version = 11 : i64} {
  func.func @_ffn_resident_kernel(%arg0: i32, %arg1: memref<8x128xf32, #tpu.memory_space<vmem>>, %arg2: memref<128x128xf32, #tpu.memory_space<vmem>>, %arg3: memref<1x128xf32, #tpu.memory_space<vmem>>, %arg4: memref<128x128xf32, #tpu.memory_space<vmem>>, %arg5: memref<1x128xf32, #tpu.memory_space<vmem>>, %arg6: memref<1x128xf32, #tpu.memory_space<vmem>>, %arg7: memref<1x128xf32, #tpu.memory_space<vmem>>, %arg8: memref<8x128xf32, #tpu.memory_space<vmem>>) attributes {dimension_semantics = [#tpu.dimension_semantics<parallel>], iteration_bounds = array<i64: 2>, scalar_prefetch = 0 : i64, scratch_operands = 0 : i64, tpu.core_type = #tpu.core_type<tc>, window_params = [{transform_indices = @transform_0, window_bounds = array<i64: 8, 128>}, {pipeline_mode = #tpu.pipeline_mode<synchronous>, transform_indices = @transform_1, window_bounds = array<i64: 128, 128>}, {pipeline_mode = #tpu.pipeline_mode<synchronous>, transform_indices = @transform_2, window_bounds = array<i64: 1, 128>}, {pipeline_mode = #tpu.pipeline_mode<synchronous>, transform_indices = @transform_3, window_bounds = array<i64: 128, 128>}, {pipeline_mode = #tpu.pipeline_mode<synchronous>, transform_indices = @transform_4, window_bounds = array<i64: 1, 128>}, {pipeline_mode = #tpu.pipeline_mode<synchronous>, transform_indices = @transform_5, window_bounds = array<i64: 1, 128>}, {pipeline_mode = #tpu.pipeline_mode<synchronous>, transform_indices = @transform_6, window_bounds = array<i64: 1, 128>}, {transform_indices = @transform_7, window_bounds = array<i64: 8, 128>}]} {
    %c0 = arith.constant 0 : index
    %c0_0 = arith.constant 0 : index
    %0 = vector.load %arg1[%c0, %c0_0] : memref<8x128xf32, #tpu.memory_space<vmem>>, vector<8x128xf32>
    %c0_1 = arith.constant 0 : index
    %c0_2 = arith.constant 0 : index
    %1 = vector.load %arg2[%c0_1, %c0_2] : memref<128x128xf32, #tpu.memory_space<vmem>>, vector<128x128xf32>
    %cst = arith.constant dense<0.000000e+00> : vector<8x128xf32>
    %2 = tpu.matmul %0, %1, %cst {dimension_numbers = #tpu.dot_dimension_numbers<[1], [0], [0], [1], [0, 0, 1, 1], [], []>} : vector<8x128xf32>, vector<128x128xf32>, vector<8x128xf32> -> vector<8x128xf32>
    %c0_3 = arith.constant 0 : index
    %c0_4 = arith.constant 0 : index
    %3 = vector.load %arg3[%c0_3, %c0_4] : memref<1x128xf32, #tpu.memory_space<vmem>>, vector<1x128xf32>
    %4 = vector.broadcast %3 : vector<1x128xf32> to vector<8x128xf32>
    %5 = arith.addf %2, %4 : vector<8x128xf32>
    %cst_5 = arith.constant 0.000000e+00 : f32
    %6 = vector.broadcast %cst_5 : f32 to vector<8x128xf32>
    %7 = arith.maximumf %5, %6 : vector<8x128xf32>
    %c0_6 = arith.constant 0 : index
    %c0_7 = arith.constant 0 : index
    %8 = vector.load %arg4[%c0_6, %c0_7] : memref<128x128xf32, #tpu.memory_space<vmem>>, vector<128x128xf32>
    %cst_8 = arith.constant dense<0.000000e+00> : vector<8x128xf32>
    %9 = tpu.matmul %7, %8, %cst_8 {dimension_numbers = #tpu.dot_dimension_numbers<[1], [0], [0], [1], [0, 0, 1, 1], [], []>} : vector<8x128xf32>, vector<128x128xf32>, vector<8x128xf32> -> vector<8x128xf32>
    %c0_9 = arith.constant 0 : index
    %c0_10 = arith.constant 0 : index
    %10 = vector.load %arg5[%c0_9, %c0_10] : memref<1x128xf32, #tpu.memory_space<vmem>>, vector<1x128xf32>
    %11 = vector.broadcast %10 : vector<1x128xf32> to vector<8x128xf32>
    %12 = arith.addf %9, %11 : vector<8x128xf32>
    %13 = arith.addf %0, %12 : vector<8x128xf32>
    %cst_11 = arith.constant dense<0.000000e+00> : vector<8xf32>
    %14 = vector.multi_reduction <add>, %13, %cst_11 [1] : vector<8x128xf32> to vector<8xf32>
    %15 = vector.shape_cast %14 : vector<8xf32> to vector<8x1xf32>
    %cst_12 = arith.constant 3.125000e-02 : f32
    %16 = vector.broadcast %cst_12 : f32 to vector<8x1xf32>
    %17 = arith.mulf %15, %16 : vector<8x1xf32>
    %18 = vector.broadcast %17 : vector<8x1xf32> to vector<8x128xf32>
    %19 = arith.subf %13, %18 : vector<8x128xf32>
    %20 = tpu.iota {dimensions = array<i32: 1>} : vector<1x128xi32>
    %c32_i32 = arith.constant 32 : i32
    %21 = vector.broadcast %c32_i32 : i32 to vector<1x128xi32>
    %22 = arith.cmpi slt, %20, %21 : vector<1x128xi32>
    %cst_13 = arith.constant 0.000000e+00 : f32
    %23 = vector.shape_cast %22 : vector<1x128xi1> to vector<1x128xi1>
    %24 = vector.broadcast %23 : vector<1x128xi1> to vector<8x128xi1>
    %25 = vector.broadcast %cst_13 : f32 to vector<8x128xf32>
    %26 = arith.select %24, %19, %25 : vector<8x128xi1>, vector<8x128xf32>
    %27 = arith.mulf %26, %26 : vector<8x128xf32>
    %cst_14 = arith.constant dense<0.000000e+00> : vector<8xf32>
    %28 = vector.multi_reduction <add>, %27, %cst_14 [1] : vector<8x128xf32> to vector<8xf32>
    %29 = vector.shape_cast %28 : vector<8xf32> to vector<8x1xf32>
    %cst_15 = arith.constant 3.125000e-02 : f32
    %30 = vector.broadcast %cst_15 : f32 to vector<8x1xf32>
    %31 = arith.mulf %29, %30 : vector<8x1xf32>
    %cst_16 = arith.constant 9.99999974E-6 : f32
    %32 = vector.broadcast %cst_16 : f32 to vector<8x1xf32>
    %33 = arith.addf %31, %32 : vector<8x1xf32>
    %34 = math.rsqrt %33 : vector<8x1xf32>
    %35 = vector.broadcast %34 : vector<8x1xf32> to vector<8x128xf32>
    %36 = arith.mulf %26, %35 : vector<8x128xf32>
    %c0_17 = arith.constant 0 : index
    %c0_18 = arith.constant 0 : index
    %37 = vector.load %arg6[%c0_17, %c0_18] : memref<1x128xf32, #tpu.memory_space<vmem>>, vector<1x128xf32>
    %38 = vector.broadcast %37 : vector<1x128xf32> to vector<8x128xf32>
    %39 = arith.mulf %36, %38 : vector<8x128xf32>
    %c0_19 = arith.constant 0 : index
    %c0_20 = arith.constant 0 : index
    %40 = vector.load %arg7[%c0_19, %c0_20] : memref<1x128xf32, #tpu.memory_space<vmem>>, vector<1x128xf32>
    %41 = vector.broadcast %40 : vector<1x128xf32> to vector<8x128xf32>
    %42 = arith.addf %39, %41 : vector<8x128xf32>
    %c0_21 = arith.constant 0 : index
    %c0_22 = arith.constant 0 : index
    %43 = vector.load %arg8[%c0_21, %c0_22] : memref<8x128xf32, #tpu.memory_space<vmem>>, vector<8x128xf32>
    tpu.vector_store %arg8[%c0_21, %c0_22], %42 {strides = array<i32>} : memref<8x128xf32, #tpu.memory_space<vmem>>, vector<8x128xf32>,
    return
  }
  func.func @transform_0(%arg0: i32) -> (i32, i32) {
    %c0_i32 = arith.constant 0 : i32
    %c0_i32_0 = arith.constant 0 : i32
    return %arg0, %c0_i32 : i32, i32
  }
  func.func @transform_1(%arg0: i32) -> (i32, i32) {
    %c0_i32 = arith.constant 0 : i32
    %c0_i32_0 = arith.constant 0 : i32
    %c0_i32_1 = arith.constant 0 : i32
    return %c0_i32, %c0_i32_0 : i32, i32
  }
  func.func @transform_2(%arg0: i32) -> (i32, i32) {
    %c0_i32 = arith.constant 0 : i32
    %c0_i32_0 = arith.constant 0 : i32
    %c0_i32_1 = arith.constant 0 : i32
    return %c0_i32, %c0_i32_0 : i32, i32
  }
  func.func @transform_3(%arg0: i32) -> (i32, i32) {
    %c0_i32 = arith.constant 0 : i32
    %c0_i32_0 = arith.constant 0 : i32
    %c0_i32_1 = arith.constant 0 : i32
    return %c0_i32, %c0_i32_0 : i32, i32
  }
  func.func @transform_4(%arg0: i32) -> (i32, i32) {
    %c0_i32 = arith.constant 0 : i32
    %c0_i32_0 = arith.constant 0 : i32
    %c0_i32_1 = arith.constant 0 : i32
    return %c0_i32, %c0_i32_0 : i32, i32
  }
  func.func @transform_5(%arg0: i32) -> (i32, i32) {
    %c0_i32 = arith.constant 0 : i32
    %c0_i32_0 = arith.constant 0 : i32
    %c0_i32_1 = arith.constant 0 : i32
    return %c0_i32, %c0_i32_0 : i32, i32
  }
  func.func @transform_6(%arg0: i32) -> (i32, i32) {
    %c0_i32 = arith.constant 0 : i32
    %c0_i32_0 = arith.constant 0 : i32
    %c0_i32_1 = arith.constant 0 : i32
    return %c0_i32, %c0_i32_0 : i32, i32
  }
  func.func @transform_7(%arg0: i32) -> (i32, i32) {
    %c0_i32 = arith.constant 0 : i32
    %c0_i32_0 = arith.constant 0 : i32
    return %arg0, %c0_i32 : i32, i32
  }
}

</mosaic_0001>

<bundles_post_ra>
// kernel: tpu_custom_call.1
= control target key start
LH: loop header
LB: loop body
LE: loop exit
PB: predicated region body
PF: predicated region fallthrough
CT: control target
= control target key end

     0   :  { %s1015_s0 = inlined_call_operand.hbm [shape: f32[16,128], index: 0, kind: input, shape index: {}]   ;;  %s1016_s1 = inlined_call_operand.hbm [shape: f32[128,128], index: 1, kind: input, shape index: {}]   ;;  %s1017_s2 = inlined_call_operand.vmem [shape: f32[1,128], index: 2, kind: input, shape index: {}]   ;;  %s1018_s3 = inlined_call_operand.hbm [shape: f32[128,128], index: 3, kind: input, shape index: {}]   ;;  %s1019_s4 = inlined_call_operand.vmem [shape: f32[1,128], index: 4, kind: input, shape index: {}]   ;;  %s1020_s5 = inlined_call_operand.vmem [shape: f32[1,128], index: 5, kind: input, shape index: {}]   ;;  %s1021_s6 = inlined_call_operand.vmem [shape: f32[1,128], index: 6, kind: input, shape index: {}]   ;;  %s1022_s7 = inlined_call_operand.hbm [shape: f32[16,128], index: 7, kind: output, shape index: {}]  }
   0x1   :  { %1023 = sst [smem:[#allocation12_spill]] %s1016_s1 }
   0x2   :  { %1024 = sst [smem:[#allocation13_spill]] %s1018_s3 }
   0x3   :  { %12 = vsyncpa [#allocation3], 0 }
   0x4   :  { %14 = vsyncpa [#allocation3 + $0x1], 0 }
   0x5   :  { %15 = vsyncpa [#allocation6], 0 }
   0x6   :  { %16 = vsyncpa [#allocation4], 0 }
   0x7   :  { %18 = vsyncpa [#allocation4 + $0x1], 0  ;;  %s851_s24 = smov 0   ;;  %s853_s25 = smov 0  }
   0x8   :  { %s855_s26 = smov 0   ;;  %s857_s27 = smov 0  }
   0x9 LB: > { %s1025_s1 = sld [smem:[#allocation12_spill]]  ;;  %s875_s8 = sadd.s32 4294967295, %s805_s27   ;;  %s805_s27 = sphi %s857_s27, %s1037_s27   ;;  %s801_s26 = sphi %s855_s26, %s1036_s26   ;;  %s797_s25 = sphi %s853_s25, %s1035_s25   ;;  %s793_s24 = sphi %s851_s24, %s1034_s24  }
   0xa   : > { %p555_p0 = scmp.ge.s32.totalorder %s805_s27, 1  ;;  %p45_p1 = scmp.eq.s32.totalorder %s875_s8, 0 }
   0xb   : > { %p207_p2 = scmp.lt.s32.totalorder %s805_s27, 3  ;;  %s807_s10 = smov [#allocation5]  }
   0xc   : > { %s220_s11 = sshll.u32 %s807_s10, 4  ;;  %s1027_s3 = sld [smem:[#allocation13_spill]]  ;;  %s221_s11 = int_to_ptr.vmem [resolvable:$true] %s220_s11 }
   0xd   : > { %p880_p3 = pnand %p555_p0, %p207_p2  ;;  %s808_s15 = smov [#allocation7]  }
   0xe   : > { %s237_s16 = sshll.u32 %s808_s15, 4  ;;  %s809_s17 = smov 128   ;;  %s238_s16 = int_to_ptr.vmem [resolvable:$true] %s237_s16 }
   0xf   : > { %s218_s30 = sshll.u32 %s1025_s1, 4  ;;  %p582_p4 = pneg %p880_p3  ;;  %s219_s30 = int_to_ptr.hbm [resolvable:$true] %s218_s30 }
  0x10   : > { %s810_s18 = smov 8   ;;  %s554_s19 = sadd.s32 4294967294, %s805_s27  }
  0x11   : > { %p583_p6 = pnand %p582_p4, %p45_p1  ;;  %s894_s20 = sadd.s32 1, %s805_s27  }
  0x12   : > { %s235_s14 = sshll.u32 %s1027_s3, 4  ;;  %s28_s21 = ssub.s32 %s805_s27, %s894_s20  ;;  %s236_s14 = int_to_ptr.hbm [resolvable:$true] %s235_s14 }
  0x13   : > { %585 = dma.hbm_to_vmem [thread:$0]  (!%p583_p6), %s219_s30, 2048, %s221_s11, [#allocation6], %s809_s17, %s809_s17, %s810_s18  }
  0x14   : > { %588 = dma.hbm_to_vmem [thread:$0]  (!%p583_p6), %s236_s14, 2048, %s238_s16, [#allocation6], %s809_s17, %s809_s17, %s810_s18  }
  0x15   : > { %s31_s22 = sadd.s32 1, %s801_s26  ;;  %p29_p7 = scmp.eq.s32.totalorder %s28_s21, 0 }
  0x16   : > { %p38_p8 = scmp.ne.s32.totalorder %s801_s26, %s797_s25  ;;  %p39_p9 = scmp.eq.s32.totalorder %s805_s27, 0 }
  0x17   : > { %p44_p10 = scmp.ne.s32.totalorder %s797_s25, %s793_s24  ;;  %p194_p13 = scmp.eq.s32.totalorder %s875_s8, 1 }
  0x18   : > { %s905_s23 = scalar_select %p29_p7, %s801_s26, %s31_s22  }
  0x19   : > { %p907_p11 = por %p39_p9, %p38_p8  ;;  %p913_p12 = por %p45_p1, %p44_p10 }
  0x1a   : > { %p200_p0 = scmp.eq.s32.totalorder %s554_s19, 1  ;;  %p599_p2 = scmp.lt.s32.totalorder %s805_s27, 2 }
  0x1b   : > { %s260_s30 = sand.u32 1, %s801_s26   ;;  %p920_p4 = por %p194_p13, %p38_p8 }
  0x1c   : > { %p924_p6 = por %p200_p0, %p44_p10  ;;  %s559_s12 = sshll.u32 %s260_s30, 3 }
  0x1d   : > { %s560_s13 = sshll.u32 %s805_s27, 3  ;;  %s264_s17 = scalar_lea.vmem [#allocation2], %s559_s12 }
  0x1e   : > { %s268_s16 = scalar_lea.hbm %s1015_s0, %s560_s13  ;;  %s272_s18 = sshll.u32 %s264_s17, 4  ;;  %s273_s18 = int_to_ptr.vmem [resolvable:$true] %s272_s18 }
  0x1f   : > { %s270_s21 = sshll.u32 %s268_s16, 4  ;;  %p934_p7 = pnand %p599_p2, %p907_p11  ;;  %s271_s21 = int_to_ptr.hbm [resolvable:$true] %s270_s21 }
  0x20   : > { %s261_s22 = scalar_lea.sflag [#allocation3], %s260_s30  ;;  %s705_s1 = sshra.s32 %s271_s21, 4  ;;  %s706_s1 = int_to_ptr.hbm [resolvable:$true] %s705_s1 }
  0x21   : > { %s707_s3 = scalar_lea.hbm %s706_s1, 8  ;;  %p709_p9 = pneg %p934_p7 }
  0x22   : > { %p708_p8 = scmp.ne.s32.totalorder %s706_s1, %s707_s3  ;;  %s712_s14 = scalar_lea.hbm %s1015_s0, 16 }
  0x23   : > { %p713_p11 = scmp.lt.s32.totalorder %s706_s1, %s1015_s0  ;;  %p714_p0 = scmp.lt.s32.totalorder %s712_s14, %s707_s3 }
  0x24   : > { %p710_p10 = pnand %p709_p9, %p708_p8 }
  0x25   : > { %p715_p2 = por %p714_p0, %p713_p11 }
  0x26   : > { %p711_p13 = pneg %p710_p10 }
  0x28   : > { %p716_p5 = pnand %p715_p2, %p711_p13 }
  0x2a   : > { %719 = shalt.err (!%p716_p5)
}
  0x2b   : > { %592 = dma.hbm_to_vmem [thread:$0]  (!%p934_p7), %s271_s21, 128, %s273_s18, %s261_s22  }
  0x2c   : > { %281 = sbr.rel (%p880_p3) target bundleno = 614 (0x266), region = 48  ;;  %s951_s30 = sand.u32 (!%p880_p3), 1, %s797_s25  }
  0x2d   : > { %s562_s16 = sshll.u32 (!%p880_p3), %s951_s30, 3  ;;  %s284_s17 = scalar_lea.sflag (!%p880_p3), [#allocation3], %s951_s30 }
  0x2e   : > { %s957_s1 = scalar_lea.vmem (!%p880_p3), [#allocation2], %s562_s16 }
  0x31   : > { %780 = dma.done.wait (%p913_p12), %s284_s17, 128  }
  0x32   : > { %782 = vsyncadd (%p913_p12), %s284_s17, 4294967168 }
  0x33   : > { %784 = dma.done.wait (%p45_p1), [#allocation6], 4096  }
  0x34   : > { %786 = vsyncadd (%p45_p1), [#allocation6], 4294963200  ;;  %v345_v0 = vld [vmem:[#allocation5 + $0x78] sm:$0xff]  ;;  %v344_v1 = vld [vmem:[#allocation5 + $0x70] sm:$0xff]  ;;  %v416_v41 = vlaneseq  ;;  %s567_s21 = sshll.u32 %s875_s8, 3  ;;  %s328_s8 = scalar_lea.vmem [#allocation8], %s562_s16 }
  0x35   : > { %350 = vmatpush.msra.mxu0 %v345_v0  ;;  %v343_v2 = vld [vmem:[#allocation5 + $0x68] sm:$0xff]  ;;  %v342_v3 = vld [vmem:[#allocation5 + $0x60] sm:$0xff]  ;;  %v386_v4 = vld [vmem:[#allocation7 + $0x78] sm:$0xff]  ;;  %s460_s14 = scalar_lea.hbm %s1022_s7, %s567_s21  ;;  %s462_s17 = sshll.u32 %s328_s8, 4  ;;  %s463_s17 = int_to_ptr.vmem [resolvable:$true] %s462_s17 }
  0x36   : > { %v341_v5 = vld [vmem:[#allocation5 + $0x58] sm:$0xff]  ;;  %391 = vmatpush.msra.mxu1 %v386_v4  ;;  %v385_v6 = vld [vmem:[#allocation7 + $0x70] sm:$0xff]  ;;  %v384_v7 = vld [vmem:[#allocation7 + $0x68] sm:$0xff]  ;;  %v417_v42 = vand.u32 127, %v416_v41  ;;  %s450_s3 = scalar_lea.sflag [#allocation4], %s951_s30  ;;  %s755_s19 = scalar_lea.hbm %s1022_s7, 16 }
  0x37   : > { %351 = vmatpush.msra.mxu0 %v344_v1  ;;  %v340_v8 = vld [vmem:[#allocation5 + $0x50] sm:$0xff]  ;;  %v383_v9 = vld [vmem:[#allocation7 + $0x60] sm:$0xff]  ;;  %v339_v10 = vld [vmem:[#allocation5 + $0x48] sm:$0xff] }
  0x38   : > { %392 = vmatpush.msra.mxu1 %v385_v6  ;;  %v382_v11 = vld [vmem:[#allocation7 + $0x58] sm:$0xff]  ;;  %v338_v12 = vld [vmem:[#allocation5 + $0x40] sm:$0xff]  ;;  %v381_v13 = vld [vmem:[#allocation7 + $0x50] sm:$0xff]  ;;  %vm418_vm0 = vcmp.lt.s32.totalorder %v417_v42, 32 }
  0x39   : > { %352 = vmatpush.msra.mxu0 %v343_v2  ;;  %v337_v14 = vld [vmem:[#allocation5 + $0x38] sm:$0xff]  ;;  %v380_v15 = vld [vmem:[#allocation7 + $0x48] sm:$0xff]  ;;  %v336_v16 = vld [vmem:[#allocation5 + $0x30] sm:$0xff] }
  0x3a   : > { %393 = vmatpush.msra.mxu1 %v384_v7  ;;  %v379_v17 = vld [vmem:[#allocation7 + $0x40] sm:$0xff]  ;;  %v335_v18 = vld [vmem:[#allocation5 + $0x28] sm:$0xff]  ;;  %v378_v19 = vld [vmem:[#allocation7 + $0x38] sm:$0xff] }
  0x3b   : > { %353 = vmatpush.msra.mxu0 %v342_v3  ;;  %v334_v20 = vld [vmem:[#allocation5 + $0x20] sm:$0xff]  ;;  %v377_v21 = vld [vmem:[#allocation7 + $0x30] sm:$0xff]  ;;  %v333_v22 = vld [vmem:[#allocation5 + $0x18] sm:$0xff] }
  0x3c   : > { %394 = vmatpush.msra.mxu1 %v383_v9  ;;  %v376_v23 = vld [vmem:[#allocation7 + $0x28] sm:$0xff]  ;;  %v332_v24 = vld [vmem:[#allocation5 + $0x10] sm:$0xff]  ;;  %v375_v25 = vld [vmem:[#allocation7 + $0x20] sm:$0xff] }
  0x3d   : > { %354 = vmatpush.msra.mxu0 %v341_v5  ;;  %v331_v26 = vld [vmem:[#allocation5 + $0x8] sm:$0xff]  ;;  %v374_v27 = vld [vmem:[#allocation7 + $0x18] sm:$0xff]  ;;  %v330_v28 = vld [vmem:[#allocation5] sm:$0xff] }
  0x3e   : > { %395 = vmatpush.msra.mxu1 %v382_v11  ;;  %v329_v29 = vld [vmem:[%s957_s1] sm:$0xff]  ;;  %v372_v31 = vld [vmem:[#allocation7 + $0x8] sm:$0xff]  ;;  %v371_v32 = vld [vmem:[#allocation7] sm:$0xff]  ;;  %s464_s1 = sshll.u32 %s460_s14, 4  ;;  %s465_s1 = int_to_ptr.hbm [resolvable:$true] %s464_s1 }
  0x3f   : > { %355 = vmatpush.msra.mxu0 %v340_v8  ;;  %v373_v30 = vld [vmem:[#allocation7 + $0x10] sm:$0xff]  ;;  %s749_s9 = sshra.s32 %s465_s1, 4  ;;  %s750_s9 = int_to_ptr.hbm [resolvable:$true] %s749_s9 }
  0x40   : > { %396 = vmatpush.msra.mxu1 %v381_v13  ;;  %v639_v33 = vld [vmem:[%s1017_s2] ss:$0 sm:$0xff]  ;;  %s751_s29 = scalar_lea.hbm %s750_s9, 8  ;;  %p756_p12 = scmp.lt.s32.totalorder %s750_s9, %s1022_s7 }
  0x41   : > { %356 = vmatpush.msra.mxu0 %v339_v10  ;;  %v640_v37 = vld [vmem:[%s1019_s4] ss:$0 sm:$0xff]  ;;  %p752_p1 = scmp.ne.s32.totalorder %s750_s9, %s751_s29  ;;  %p757_p7 = scmp.lt.s32.totalorder %s755_s19, %s751_s29 }
  0x42   : > { %397 = vmatpush.msra.mxu1 %v380_v15  ;;  %v641_v57 = vld [vmem:[%s1020_s5] ss:$0 sm:$0xff] }
  0x43   : > { %357 = vmatpush.msra.mxu0 %v338_v12  ;;  %v642_v60 = vld [vmem:[%s1021_s6] ss:$0 sm:$0xff]  ;;  %p753_p3 = pnand %p752_p1, %p920_p4  ;;  %p758_p8 = por %p757_p7, %p756_p12 }
  0x44   : > { %398 = vmatpush.msra.mxu1 %v379_v17 }
  0x45   : > { %358 = vmatpush.msra.mxu0 %v337_v14  ;;  %p754_p5 = pneg %p753_p3 }
  0x46   : > { %399 = vmatpush.msra.mxu1 %v378_v19 }
  0x47   : > { %359 = vmatpush.msra.mxu0 %v336_v16  ;;  %p759_p9 = pnand %p758_p8, %p754_p5 }
  0x48   : > { %400 = vmatpush.msra.mxu1 %v377_v21 }
  0x49   : > { %360 = vmatpush.msra.mxu0 %v335_v18 }
  0x4a   : > { %401 = vmatpush.msra.mxu1 %v376_v23 }
  0x4b   : > { %361 = vmatpush.msra.mxu0 %v334_v20 }
  0x4c   : > { %402 = vmatpush.msra.mxu1 %v375_v25 }
  0x4d   : > { %362 = vmatpush.msra.mxu0 %v333_v22 }
  0x4e   : > { %403 = vmatpush.msra.mxu1 %v374_v27 }
  0x4f   : > { %363 = vmatpush.msra.mxu0 %v332_v24 }
  0x50   : > { %404 = vmatpush.msra.mxu1 %v373_v30 }
  0x51   : > { %364 = vmatpush.msra.mxu0 %v331_v26 }
  0x52   : > { %405 = vmatpush.msra.mxu1 %v372_v31 }
  0x53   : > { %365 = vmatpush.msra.mxu0 %v330_v28 }
  0x54   : > { %366 = vmatmul.f32.vlgmr.msra.gmra.mxu0 %v329_v29  ;;  %406 = vmatpush.msra.mxu1 %v371_v32 }
  0xd1   : > { %v367_v34 = vpop.f32.mrf.mxu0 }
  0xd2   : > { %v368_v35 = vadd.f32 %v639_v33, %v367_v34 }
  0xd4   : > { %v370_v36 = vmax.f32 %v368_v35, 0.0 }
  0xd6   : > { %407 = vmatmul.f32.vlgmr.msra.gmra.mxu1 %v370_v36 }
 0x153   : > { %v408_v38 = vpop.f32.mrf.mxu1 }
 0x154   : > { %v409_v39 = vadd.f32 %v640_v37, %v408_v38 }
 0x156   : > { %v411_v40 = vadd.f32 %v409_v39, %v329_v29 }
 0x158   : > { %412 = vadd.xlane.f32.xlu0 %v411_v40 }
 0x1cb   : > { %v413_v43 = vpop.xlane.xlu0 %412 }
 0x1cc   : > { %v414_v44 = vmul.f32 0.03125, %v413_v43 }
 0x1ce   : > { %v415_v45 = vsub.f32 %v411_v40, %v414_v44 }
 0x1d0   : > { %v421_v46 = vsel %vm418_vm0, %v415_v45, 0.0 }
 0x1d1   : > { %v422_v47 = vmul.f32 %v421_v46, %v421_v46 }
 0x1d3   : > { %423 = vadd.xlane.f32.xlu0 %v422_v47 }
 0x246   : > { %v424_v48 = vpop.xlane.xlu0 %423 }
 0x247   : > { %v425_v49 = vmul.f32 0.03125, %v424_v48 }
 0x249   : > { %v426_v50 = vadd.f32 1e-05, %v425_v49 }
 0x24b   : > { %643 = vrsqrt.f32 %v426_v50  ;;  %vm433_vm2 = vweird.f32 %v426_v50 }
 0x251   : > { %v644_v51 = vpop.eup %643 }
 0x252   : > { %v428_v52 = vmul.f32 %v644_v51, %v426_v50  ;;  %vm434_vm1 = vweird.f32 %v644_v51 }
 0x253   : > { %vm435_vm3 = vmor %vm433_vm2, %vm434_vm1 }
 0x254   : > { %v429_v53 = vmul.f32 %v644_v51, %v428_v52 }
 0x256   : > { %v430_v54 = vmul.f32 0.5, %v429_v53 }
 0x258   : > { %v431_v55 = vsub.f32 1.5, %v430_v54 }
 0x25a   : > { %v432_v56 = vmul.f32 %v644_v51, %v431_v55 }
 0x25c   : > { %v436_v58 = vsel %vm435_vm3, %v644_v51, %v432_v56 }
 0x25d   : > { %v437_v59 = vmul.f32 %v436_v58, %v421_v46 }
 0x25f   : > { %v442_v61 = vmul.f32 %v641_v57, %v437_v59 }
 0x261   : > { %v447_v62 = vadd.f32 %v642_v60, %v442_v61 }
 0x263   : > { %448 = vst [vmem:[%s328_s8] sm:$0xff] %v447_v62 }
 0x264   : > { %762 = shalt.err (!%p759_p9)
}
 0x265   : > { %580 = dma.vmem_to_hbm [thread:$0]  (%p920_p4), %s463_s17, 128, %s465_s1, %s450_s3  }
 0x266 PF: > { %s476_s30 = sand.u32 1, %s793_s24   ;;  %p1033_p10 = scmp.ge.s32.totalorder %s805_s27, 2 }
 0x267   : > { %s477_s12 = scalar_lea.sflag [#allocation4], %s476_s30 }
 0x268   : > { %p594_p13 = pnand %p1033_p10, %p924_p6 }
 0x26a   : > { %p595_p11 = pneg %p594_p13 }
 0x26c   : > { %788 = dma.done.wait (%p595_p11), %s477_s12, 128  }
 0x26d   : > { %790 = vsyncadd (%p595_p11), %s477_s12, 4294967168  ;;  %p21_p0 = scmp.ge.s32.totalorder %s894_s20, 4   ;;  %s1034_s24 = smov %s797_s25 }
 0x26e   : > { %s1035_s25 = smov %s801_s26  ;;  %s1036_s26 = smov %s905_s23 }
 0x26f   : > { %s1037_s27 = smov %s894_s20  ;;  %23 = sbr.rel (!%p21_p0) target bundleno = 9 (0x9), region = 101 }
 0x274   :  { %483 = vsyncpa [#allocation3], 1 }
 0x275   :  { %485 = vsyncpa [#allocation3 + $0x1], 1 }
 0x276   :  { %486 = vsyncpa [#allocation6], 1 }
 0x277   :  { %487 = vsyncpa [#allocation4], 1 }
 0x278   :  { %489 = vsyncpa [#allocation4 + $0x1], 1 }

</bundles_post_ra>
